<compile_context>
chip_gen: v7x
topology: tpu7x:2x2x1
jax: 0.10.0
libtpu: 0.0.40
codegen_flags: <defaults>
</compile_context>

<pallas_src>
import functools

import jax
import jax.numpy as jnp
from jax.experimental import pallas as pl
from jax.experimental.pallas import tpu as pltpu

_DEFAULT_TILE_N = 8192  # multiple of 8 (f32 sublane); ~19 MiB VMEM footprint at D=32, K*D=128


def _round_up(x, m):
    return ((x + m - 1) // m) * m


def _gmm_d2_kernel(z_ref, sflat_ref, mus_ref, out_ref, *, tile_n, kd, tail_rows, ragged):
    """Accumulates sum_{n,k} (z_n - mu_k)^T (S_k S_k^T) (z_n - mu_k) into a lane-dense block."""
    c = pl.program_id(0)   # core-split axis ("parallel")
    i = pl.program_id(1)   # N-tile axis ("arbitrary", reduction)

    @pl.when(i == 0)
    def _():
        out_ref[...] = jnp.zeros_like(out_ref)

    # One lane-dense MXU matmul: y[n, k*D + e] = (S_k^T z_n)_e.
    y = jnp.dot(z_ref[...], sflat_ref[...], preferred_element_type=jnp.float32)  # (tile_n, kd)
    diff = y - mus_ref[...]
    sq = diff * diff                                                              # (tile_n, kd)

    def _accumulate(vals):
        # Row-direction (sublane-group) reduction: vreg-wise VALU adds only; the cross-lane
        # collapse to a scalar happens once, in the wrapper.
        out_ref[...] += jnp.sum(vals.reshape(tile_n // 8, 8, kd), axis=0)

    if ragged:
        is_last = jnp.logical_and(c == pl.num_programs(0) - 1,
                                  i == pl.num_programs(1) - 1)

        @pl.when(jnp.logical_not(is_last))
        def _():
            _accumulate(sq)

        @pl.when(is_last)
        def _():
            # Out-of-bounds rows of the ragged last block are undefined; use a select (not a
            # multiply) so NaN/Inf garbage cannot poison the sum.
            row = jax.lax.broadcasted_iota(jnp.int32, (tile_n, kd), 0)
            _accumulate(jnp.where(row < tail_rows, sq, 0.0))
    else:
        _accumulate(sq)


def gaussian_mixture_loss(z, mu, sigma_inv, *, tile_n=_DEFAULT_TILE_N, core_splits=2):
    """JAX/Pallas equivalent of GaussianMixtureLoss.forward(z, mu, sigma_inv)."""
    z = z.astype(jnp.float32)
    mu = mu.astype(jnp.float32)
    sigma_inv = sigma_inv.astype(jnp.float32)

    n = z.shape[0]
    d_dim = z.shape[2]
    k = mu.shape[0]
    kd = k * d_dim
    assert mu.shape == (k, d_dim)
    assert sigma_inv.shape == (k, d_dim, d_dim)

    z2 = z.reshape(n, d_dim)  # drop the broadcast singleton axis

    # ---- cluster-side precompute (hoisted out of the streaming kernel) ----
    # S_flat[d, k*D + e] = sigma_inv[k, d, e]   -> (D, K*D)
    s_flat = jnp.transpose(sigma_inv, (1, 0, 2)).reshape(d_dim, kd)
    # (S_k^T mu_k)_e flattened                  -> (1, K*D)
    mu_s = jnp.einsum('kd,kde->ke', mu, sigma_inv).reshape(1, kd)
    # log det(S S^T) = 2 * log|det S|  (robust slogdet; no Pallas det primitive, tiny work)
    logdet = 2.0 * jnp.linalg.slogdet(sigma_inv)[1]                        # (K,)

    # ---- tiling over N (no full pad copy of z; ragged last tile masked in-kernel) ----
    tn = _round_up(max(8, min(int(tile_n), _round_up(n, 8))), 8)
    num_tiles = pl.cdiv(n, tn)
    ragged = (n % tn) != 0
    tail_rows = n - (num_tiles - 1) * tn

    # v7x: spread the N loop over the two TensorCores via a leading "parallel" axis with a
    # per-split accumulator block.  Falls back to 1 split when it would not divide evenly;
    # costs nothing on single-TC v5e/v6e.
    splits = core_splits if (core_splits > 1 and num_tiles >= core_splits
                             and num_tiles % core_splits == 0) else 1
    tiles_per_split = num_tiles // splits

    kernel = functools.partial(_gmm_d2_kernel, tile_n=tn, kd=kd,
                               tail_rows=tail_rows, ragged=ragged)

    # Explicit scoped-VMEM budget: double-buffered z, the (tile_n, K*D) intermediates and the
    # resident constants, clamped to stay inside v7x's 64 MiB physical VMEM.
    vmem_bytes = 4 * (2 * tn * d_dim + 6 * tn * kd + 2 * d_dim * kd + 4 * kd + 16 * kd)
    vmem_limit = int(min(max(vmem_bytes, 32 * 1024 * 1024), 56 * 1024 * 1024))

    cost = pl.CostEstimate(
        flops=2 * n * d_dim * kd + 4 * n * kd,
        transcendentals=0,
        bytes_accessed=4 * (n * d_dim + d_dim * kd + kd + splits * 8 * kd),
    )

    partials = pl.pallas_call(
        kernel,
        out_shape=jax.ShapeDtypeStruct((splits * 8, kd), jnp.float32),
        grid=(splits, tiles_per_split),
        in_specs=[
            pl.BlockSpec((tn, d_dim), lambda c, i: (c * tiles_per_split + i, 0)),  # z: streamed
            pl.BlockSpec((d_dim, kd), lambda c, i: (0, 0)),                        # S_flat: resident
            pl.BlockSpec((1, kd), lambda c, i: (0, 0)),                            # S^T mu: resident
        ],
        out_specs=pl.BlockSpec((8, kd), lambda c, i: (c, 0)),   # lane-dense per-split accumulator
        compiler_params=pltpu.CompilerParams(
            dimension_semantics=("parallel", "arbitrary"),
            vmem_limit_bytes=vmem_limit),
        cost_estimate=cost,
    )(z2, s_flat, mu_s)

    d2_sum = jnp.sum(partials)  # final lane/sublane collapse in the wrapper

    # loss = -mean_{n,k}(ll) = 0.5*mean_k(logdet) + 0.5*sum(d2)/(N*K) + D/2*log(2*pi)
    const = 0.5 * jnp.mean(logdet) + 0.5 * d_dim * jnp.log(2.0 * jnp.pi)
    return const + 0.5 * d2_sum / jnp.float32(n * k)


def gaussian_mixture_loss_ref(z, mu, sigma_inv):
    """Pure-jnp reference mirroring the PyTorch op order."""
    n = z.shape[0]
    d_dim = z.shape[2]
    k = mu.shape[0]
    diff = z.reshape(n, 1, d_dim) - mu.reshape(1, k, d_dim)            # (N, K, D)
    m = jnp.einsum('kde,kfe->kdf', sigma_inv, sigma_inv)               # S S^T
    d2 = jnp.einsum('nkd,kdf,nkf->nk', diff, m, diff)                  # (N, K)
    logdet = jnp.log(jnp.linalg.det(m))                                # (K,)
    ll = -0.5 * (logdet[None, :] + d2) - d_dim * 0.5 * jnp.log(2.0 * jnp.pi)
    return -jnp.mean(ll)


if __name__ == "__main__":
    key = jax.random.PRNGKey(0)
    k_mu, k_sig, k_z, k_z2 = jax.random.split(key, 4)

    K, D = 4, 32  # K*D = 128 -> lane-dense MXU output
    mu = jax.random.normal(k_mu, (K, D), dtype=jnp.float32)
    # well-conditioned sigma_inv so log det is finite and moderate
    sigma_inv = (jnp.eye(D, dtype=jnp.float32)[None, :, :]
                 + 0.1 * jax.random.normal(k_sig, (K, D, D), dtype=jnp.float32))

    # Case 1: default path (single tile covering all of N).
    z = jax.random.normal(k_z, (40, 1, D), dtype=jnp.float32)
    ref = gaussian_mixture_loss_ref(z, mu, sigma_inv)
    out = gaussian_mixture_loss(z, mu, sigma_inv)
    jax.block_until_ready(out)
    assert jnp.isfinite(out), "non-finite kernel output"
    assert jnp.allclose(out, ref, rtol=1e-3, atol=1e-4), (out, ref)

    # Case 2: multi-tile grid with a ragged last tile (exercises accumulation + pl.when mask).
    out_ragged = gaussian_mixture_loss(z, mu, sigma_inv, tile_n=16)
    jax.block_until_ready(out_ragged)
    assert jnp.allclose(out_ragged, ref, rtol=1e-3, atol=1e-4), (out_ragged, ref)

    # Case 3: two-way core split (v7x path; cheap serial loop on v5e/v6e) + ragged tail.
    z_b = jax.random.normal(k_z2, (88, 1, D), dtype=jnp.float32)
    ref_b = gaussian_mixture_loss_ref(z_b, mu, sigma_inv)
    out_b = gaussian_mixture_loss(z_b, mu, sigma_inv, tile_n=16, core_splits=2)
    jax.block_until_ready(out_b)
    assert jnp.allclose(out_b, ref_b, rtol=1e-3, atol=1e-4), (out_b, ref_b)

    print("KERNEL_OK")
</pallas_src>

<mosaic_0001>
module attributes {stable_mosaic.version = 11 : i64} {
  func.func @_gmm_d2_kernel(%arg0: i32, %arg1: i32, %arg2: memref<40x32xf32, #tpu.memory_space<vmem>>, %arg3: memref<32x128xf32, #tpu.memory_space<vmem>>, %arg4: memref<1x128xf32, #tpu.memory_space<vmem>>, %arg5: memref<8x128xf32, #tpu.memory_space<vmem>>) attributes {dimension_semantics = [#tpu.dimension_semantics<parallel>, #tpu.dimension_semantics<arbitrary>], iteration_bounds = array<i64: 1, 1>, scalar_prefetch = 0 : i64, scratch_operands = 0 : i64, tpu.core_type = #tpu.core_type<tc>, window_params = [{transform_indices = @transform_0, window_bounds = array<i64: 40, 32>}, {pipeline_mode = #tpu.pipeline_mode<synchronous>, transform_indices = @transform_1, window_bounds = array<i64: 32, 128>}, {pipeline_mode = #tpu.pipeline_mode<synchronous>, transform_indices = @transform_2, window_bounds = array<i64: 1, 128>}, {transform_indices = @transform_3, window_bounds = array<i64: 8, 128>}]} {
    %c0_i32 = arith.constant 0 : i32
    %0 = arith.cmpi eq, %arg1, %c0_i32 : i32
    %1 = arith.extui %0 : i1 to i32
    %c0_i32_0 = arith.constant 0 : i32
    %2 = arith.cmpi ne, %1, %c0_i32_0 : i32
    scf.if %2 {
      %cst_11 = arith.constant 0.000000e+00 : f32
      %15 = vector.broadcast %cst_11 : f32 to vector<8x128xf32>
      %c0_12 = arith.constant 0 : index
      %c0_13 = arith.constant 0 : index
      %16 = vector.load %arg5[%c0_12, %c0_13] : memref<8x128xf32, #tpu.memory_space<vmem>>, vector<8x128xf32>
      tpu.vector_store %arg5[%c0_12, %c0_13], %15 {strides = array<i32>} : memref<8x128xf32, #tpu.memory_space<vmem>>, vector<8x128xf32>,
    } else {
    }
    %c0 = arith.constant 0 : index
    %c0_1 = arith.constant 0 : index
    %3 = vector.load %arg2[%c0, %c0_1] : memref<40x32xf32, #tpu.memory_space<vmem>>, vector<40x32xf32>
    %c0_2 = arith.constant 0 : index
    %c0_3 = arith.constant 0 : index
    %4 = vector.load %arg3[%c0_2, %c0_3] : memref<32x128xf32, #tpu.memory_space<vmem>>, vector<32x128xf32>
    %cst = arith.constant dense<0.000000e+00> : vector<40x128xf32>
    %5 = tpu.matmul %3, %4, %cst {dimension_numbers = #tpu.dot_dimension_numbers<[1], [0], [0], [1], [0, 0, 1, 1], [], []>} : vector<40x32xf32>, vector<32x128xf32>, vector<40x128xf32> -> vector<40x128xf32>
    %c0_4 = arith.constant 0 : index
    %c0_5 = arith.constant 0 : index
    %6 = vector.load %arg4[%c0_4, %c0_5] : memref<1x128xf32, #tpu.memory_space<vmem>>, vector<1x128xf32>
    %7 = vector.broadcast %6 : vector<1x128xf32> to vector<40x128xf32>
    %8 = arith.subf %5, %7 : vector<40x128xf32>
    %9 = arith.mulf %8, %8 : vector<40x128xf32>
    %c0_6 = arith.constant 0 : index
    %c0_7 = arith.constant 0 : index
    %10 = vector.load %arg5[%c0_6, %c0_7] : memref<8x128xf32, #tpu.memory_space<vmem>>, vector<8x128xf32>
    %11 = vector.shape_cast %9 : vector<40x128xf32> to vector<5x8x128xf32>
    %cst_8 = arith.constant dense<0.000000e+00> : vector<8x128xf32>
    %12 = vector.multi_reduction <add>, %11, %cst_8 [0] : vector<5x8x128xf32> to vector<8x128xf32>
    %13 = arith.addf %10, %12 : vector<8x128xf32>
    %c0_9 = arith.constant 0 : index
    %c0_10 = arith.constant 0 : index
    %14 = vector.load %arg5[%c0_9, %c0_10] : memref<8x128xf32, #tpu.memory_space<vmem>>, vector<8x128xf32>
    tpu.vector_store %arg5[%c0_9, %c0_10], %13 {strides = array<i32>} : memref<8x128xf32, #tpu.memory_space<vmem>>, vector<8x128xf32>,
    return
  }
  func.func @transform_0(%arg0: i32, %arg1: i32) -> (i32, i32) {
    %c1_i32 = arith.constant 1 : i32
    %0 = arith.muli %arg0, %c1_i32 : i32
    %1 = arith.addi %0, %arg1 : i32
    %c0_i32 = arith.constant 0 : i32
    %c0_i32_0 = arith.constant 0 : i32
    return %1, %c0_i32 : i32, i32
  }
  func.func @transform_1(%arg0: i32, %arg1: i32) -> (i32, i32) {
    %c0_i32 = arith.constant 0 : i32
    %c0_i32_0 = arith.constant 0 : i32
    %c0_i32_1 = arith.constant 0 : i32
    return %c0_i32, %c0_i32_0 : i32, i32
  }
  func.func @transform_2(%arg0: i32, %arg1: i32) -> (i32, i32) {
    %c0_i32 = arith.constant 0 : i32
    %c0_i32_0 = arith.constant 0 : i32
    %c0_i32_1 = arith.constant 0 : i32
    return %c0_i32, %c0_i32_0 : i32, i32
  }
  func.func @transform_3(%arg0: i32, %arg1: i32) -> (i32, i32) {
    %c0_i32 = arith.constant 0 : i32
    %c0_i32_0 = arith.constant 0 : i32
    return %arg0, %c0_i32 : i32, i32
  }
}

</mosaic_0001>

<bundles_post_ra>
// kernel: tpu_custom_call.1
= control target key start
LH: loop header
LB: loop body
LE: loop exit
PB: predicated region body
PF: predicated region fallthrough
CT: control target
= control target key end

     0   :  { %v277_v3 = vmov 0.0|0.0   ;;  %vm278_vm0 = vmmov 0   ;;  %v279_v6 = vmov 0.0   ;;  %s348_s0 = inlined_call_operand.vmem [shape: f32[40,32], index: 0, kind: input, shape index: {}]   ;;  %s349_s1 = inlined_call_operand.vmem [shape: f32[32,128], index: 1, kind: input, shape index: {}]   ;;  %s350_s2 = inlined_call_operand.vmem [shape: f32[1,128], index: 2, kind: input, shape index: {}]   ;;  %s351_s3 = inlined_call_operand.hbm [shape: f32[8,128], index: 3, kind: output, shape index: {}]  }
   0x1   :  { %v47_v0 = vld [vmem:[%s349_s1] sm:$0xff]  ;;  %v48_v1 = vld [vmem:[%s349_s1 + $0x8] sm:$0xff]  ;;  %v49_v2 = vld [vmem:[%s349_s1 + $0x10] sm:$0xff]  ;;  %239 = vmatprep.subr.bf16.mxu0 %v277_v3  ;;  %245 = vmatprep.subr.bf16.mxu1 %v277_v3 }
   0x2   :  { %v240_v4 = vpack.c.bf16 %v48_v1, %v47_v0  ;;  %v50_v5 = vld [vmem:[%s349_s1 + $0x18] sm:$0xff]  ;;  %224 = vmatprep.mubr.msk.f32.mxu0 %vm278_vm0, %v279_v6  ;;  %233 = vmatprep.mubr.msk.f32.mxu1 %vm278_vm0, %v279_v6 }
   0x3   :  { %v243_v7 = vpack.c.bf16 %v50_v5, %v49_v2 }
   0x4   :  { %241 = vmatpush3.bf16.msra.mxu0 %v240_v4  ;;  %247 = vmatpush3.bf16.msra.mxu1 %v240_v4 }
   0x5   :  { %8 = vsyncpa [#allocation3], 0  ;;  %242 = vmatprep.subr.bf16.mxu0 %v277_v3  ;;  %246 = vmatprep.subr.bf16.mxu1 %v277_v3  ;;  %v42_v8 = vld [vmem:[%s348_s0] sm:$0xff]  ;;  %vm51_vm1 = vcmask 261120   ;;  %v45_v9 = vld [vmem:[%s348_s0 + $0x18] sm:$0xff] }
   0x6   :  { %v43_v10 = vld [vmem:[%s348_s0 + $0x8] sm:$0xff]  ;;  %v46_v11 = vld [vmem:[%s348_s0 + $0x20] sm:$0xff]  ;;  %v44_v12 = vld [vmem:[%s348_s0 + $0x10] sm:$0xff]  ;;  %s280_s0 = smov [#allocation2]  }
   0x7   :  { %v206_v14 = vld [vmem:[%s350_s2] ss:$0 sm:$0xff]  ;;  %s187_s2 = sshll.u32 %s280_s0, 4  ;;  %s188_s2 = int_to_ptr.vmem [resolvable:$true] %s187_s2 }
   0x8   :  { %244 = vmatpush3.bf16.msra.mxu0 %v243_v7  ;;  %248 = vmatpush3.bf16.msra.mxu1 %v243_v7  ;;  %s253_s4 = scalar_lea.vmem %s188_s2, 128  ;;  %p258_p1 = scmp.lt.s32.totalorder %s188_s2, %s188_s2 }
   0x9   :  { %p254_p0 = scmp.ne.s32.totalorder %s188_s2, %s253_s4  ;;  %p259_p2 = scmp.lt.s32.totalorder %s253_s4, %s253_s4 }
   0xb   :  { %225 = vmatmul.mubr.msk.f32.vlgmr.msra.gmra.mrb[0].mxu0 %vm51_vm1, %v42_v8  ;;  %234 = vmatmul.mubr.msk.f32.vlgmr.msra.gmra.mrb[0].mxu1 %vm51_vm1, %v45_v9  ;;  %p260_p3 = por %p259_p2, %p258_p1 }
   0xc   :  { %227 = vmatprep.mubr.msk.f32.mxu0 %vm278_vm0, %v279_v6  ;;  %236 = vmatprep.mubr.msk.f32.mxu1 %vm278_vm0, %v279_v6 }
   0xd   :  { %p261_p4 = pnand %p260_p3, %p254_p0 }
   0xf   :  { %228 = vmatmul.mubr.msk.f32.gmra.mrb[2].mxu0 %vm51_vm1, %v43_v10  ;;  %237 = vmatmul.mubr.msk.f32.gmra.mrb[2].mxu1 %vm51_vm1, %v46_v11 }
  0x10   :  { %230 = vmatprep.mubr.msk.f32.mxu0 %vm278_vm0, %v279_v6 }
  0x13   :  { %231 = vmatmul.mubr.msk.f32.gmra.mrb[4].mxu0 %vm51_vm1, %v44_v12 }
  0xde   :  { %v133_v13 = vpop.f32.mrb[0].mxu0  ;;  %v148_v15 = vpop.f32.mrb[0].mxu1 }
  0xdf   :  { %v226_v16 = vpop.f32.mrb[1].mxu0  ;;  %v235_v17 = vpop.f32.mrb[1].mxu1  ;;  %v164_v18 = vsub.f32 %v133_v13, %v206_v14  ;;  %v167_v28 = vsub.f32 %v148_v15, %v206_v14 }
  0xe1   :  { %v169_v24 = vmul.f32 %v164_v18, %v164_v18  ;;  %v172_v33 = vmul.f32 %v167_v28, %v167_v28 }
  0xe2   :  { %v138_v19 = vpop.f32.mrb[2].mxu0  ;;  %v153_v20 = vpop.f32.mrb[2].mxu1 }
  0xe3   :  { %v165_v21 = vsub.f32 %v138_v19, %v206_v14  ;;  %v229_v22 = vpop.f32.mrb[3].mxu0  ;;  %v238_v23 = vpop.f32.mrb[3].mxu1  ;;  %v168_v31 = vsub.f32 %v153_v20, %v206_v14 }
  0xe5   :  { %v170_v25 = vmul.f32 %v165_v21, %v165_v21  ;;  %v173_v35 = vmul.f32 %v168_v31, %v168_v31 }
  0xe6   :  { %v143_v26 = vpop.f32.mrb[4].mxu0 }
  0xe7   :  { %v175_v27 = vadd.f32 %v170_v25, %v169_v24  ;;  %v166_v29 = vsub.f32 %v143_v26, %v206_v14  ;;  %v232_v30 = vpop.f32.mrb[5].mxu0 }
  0xe9   :  { %v171_v32 = vmul.f32 %v166_v29, %v166_v29 }
  0xeb   :  { %v176_v34 = vadd.f32 %v175_v27, %v171_v32 }
  0xed   :  { %v177_v36 = vadd.f32 %v176_v34, %v172_v33 }
  0xef   :  { %v178_v37 = vadd.f32 %v177_v36, %v173_v35 }
  0xf1   :  { %180 = vst [vmem:[#allocation2] sm:$0xff] %v178_v37 }
  0xf2   :  { %264 = shalt.err (!%p261_p4)
}
  0xf3   :  { %s265_s7 = scalar_lea.hbm %s351_s3, 128 }
  0xf4   :  { %p266_p5 = scmp.ne.s32.totalorder %s351_s3, %s265_s7  ;;  %p269_p6 = scmp.lt.u32.totalorder %s265_s7, %s351_s3 }
  0xf6   :  { %p271_p7 = pnand %p269_p6, %p266_p5 }
  0xf8   :  { %274 = shalt.err (!%p271_p7)
}
  0xf9   :  { %190 = dma.vmem_to_hbm [thread:$0]  %s188_s2, 128, %s351_s3, [#allocation3]  }
  0xfa   :  { %275 = dma.done.wait [#allocation3], 128  }
  0xfb   :  { %276 = vsyncadd [#allocation3], 4294967168 }
  0xfc   :  { %194 = vsyncpa [#allocation3], 1 }

</bundles_post_ra>
